<compile_context>
chip_gen: v5e
topology: v5e:2x2
jax: 0.10.0
libtpu: 0.0.40
codegen_flags: <defaults>
</compile_context>

<pallas_src>
import functools
import math

import jax
import jax.numpy as jnp
from jax.experimental import pallas as pl
from jax.experimental.pallas import tpu as pltpu


def taylor_attn_kernel(x_ref, w_ref, mask_ref, o_ref, *, n_tokens, scale,
                       compute_dtype):
    # x_ref:    (Bt, N, C) f32 tokens for Bt batches (cast to compute dtype here)
    # w_ref:    (C, 3C)    fused qkv weight (compute_dtype), VMEM-resident
    # mask_ref: (C, C)     block-diagonal head mask (f32), VMEM-resident
    # o_ref:    (Bt, N, C) lane-dense output, columns ordered (head, d)
    bt, n, c = x_ref.shape
    w = w_ref[...]
    mask = mask_ref[...]

    # Fused all-batch / all-head QKV projection: Bt*N rows through the MXU in
    # one stream, f32 accumulation.  The cast rides the VPU, hidden under
    # DMA/MXU, instead of being a separate HBM pass in the wrapper.
    x2 = x_ref[...].reshape(bt * n, c).astype(compute_dtype)
    qkv = jnp.dot(x2, w, preferred_element_type=jnp.float32)       # (Bt*N, 3C)

    # k_sum = sum_n (k - mean_n k) == 0, so the denominator N*scale + q.k_sum
    # is the constant N*scale; fold its reciprocal into the epilogue.
    inv_den = jnp.float32(1.0 / (n_tokens * scale))                # 1/(N*scale)
    bias = jnp.float32(1.0 / n_tokens)                             # scale/(N*scale)

    # Short static unroll over the folded batches (Bt is small, compile-time).
    for b in range(bt):
        rows = slice(b * n, (b + 1) * n)
        # Column slices are free when C is a multiple of 128 (the demo C=32
        # incurs small lane relayouts, unavoidable at that width).
        q = qkv[rows, :c]
        k = qkv[rows, c:2 * c]
        v = qkv[rows, 2 * c:]

        k_hat = k - jnp.mean(k, axis=0, keepdims=True)             # (N, C)

        # g_full[c1, c2] = sum_n k_hat[n, c1] * v[n, c2]  (== k_hat^T @ v).
        # Expressed via contraction dims so no transposed operand is
        # materialized by us; if Mosaic still emits a vxpose of the (N, C)
        # operand at large N on v6e/v7x, restructure per the review.
        g_full = jax.lax.dot_general(
            k_hat.astype(compute_dtype), v.astype(compute_dtype),
            dimension_numbers=(((0,), (0,)), ((), ())),
            preferred_element_type=jnp.float32)                    # (C, C)
        g_blk = (g_full * mask).astype(compute_dtype)              # per-head blocks

        qg = jnp.dot(q.astype(compute_dtype), g_blk,
                     preferred_element_type=jnp.float32)           # (N, C)

        o_ref[b] = (qg * inv_den + bias).astype(o_ref.dtype)


@functools.partial(jax.jit,
                   static_argnames=("num_heads", "compute_dtype", "out_dtype"))
def taylor_attention(x, w_qkv, num_heads, *, compute_dtype=jnp.bfloat16,
                     out_dtype=None):
    """x: (B, N, C) f32. w_qkv: (3C, C) f32 (PyTorch nn.Linear weight layout).

    Returns (B, H, N, D), matching TaylorAttention.forward.
    """
    B, N, C = x.shape
    H = num_heads
    assert C % H == 0, "dim must be divisible by num_heads"
    D = C // H
    scale = D ** (-0.5)
    out_dtype = x.dtype if out_dtype is None else out_dtype

    # One-time weight transpose + cast (tiny; fused by XLA under jit).
    # PyTorch: qkv(x) = x @ W^T with output columns ordered (qkv, head, d).
    w_t = jnp.transpose(w_qkv).astype(compute_dtype)                # (C, 3C)

    # Block-diagonal head mask built once per call (constant index_map =>
    # single DMA, VMEM-resident across the whole grid -- not rebuilt per step).
    head_of = jnp.arange(C, dtype=jnp.int32) // D
    head_mask = (head_of[:, None] == head_of[None, :]).astype(jnp.float32)

    # Fold batches per grid step so the fused QKV matmul feeds the MXU with
    # ~256+ rows and the per-step overhead is amortized.
    bt = max(1, min(B, pl.cdiv(256, N)))
    while B % bt:
        bt -= 1

    kernel = functools.partial(taylor_attn_kernel, n_tokens=N, scale=scale,
                               compute_dtype=compute_dtype)

    grid_spec = pltpu.PrefetchScalarGridSpec(
        num_scalar_prefetch=0,
        grid=(B // bt,),
        in_specs=[
            pl.BlockSpec((bt, N, C), lambda i: (i, 0, 0)),   # x (f32, cast in-kernel)
            pl.BlockSpec((C, 3 * C), lambda i: (0, 0)),      # resident fused weight
            pl.BlockSpec((C, C), lambda i: (0, 0)),          # resident head mask
        ],
        out_specs=pl.BlockSpec((bt, N, C), lambda i: (i, 0, 0)),
    )

    z_flat = pl.pallas_call(
        kernel,
        out_shape=jax.ShapeDtypeStruct((B, N, C), out_dtype),
        grid_spec=grid_spec,
        compiler_params=pltpu.CompilerParams(
            dimension_semantics=("parallel",)),   # shards steps across v7x's 2 TCs
    )(x, w_t, head_mask)

    # Module layout is (B, H, N, D).  Consumers happy with (B, N, H, D) should
    # take z_flat.reshape(B, N, H, D) and drop this transpose entirely.
    return z_flat.reshape(B, N, H, D).transpose(0, 2, 1, 3)


def taylor_attention_ref(x, w_qkv, num_heads):
    """Pure-JAX reference mirroring the PyTorch forward exactly."""
    B, N, C = x.shape
    H = num_heads
    D = C // H
    scale = D ** (-0.5)

    qkv = x @ w_qkv.T                                            # (B, N, 3C)
    qkv = qkv.reshape(B, N, 3, H, D).transpose(2, 0, 3, 1, 4)    # (3, B, H, N, D)
    q, k, v = qkv[0], qkv[1], qkv[2]

    k_mean = jnp.mean(k, axis=2, keepdims=True)                  # (B, H, 1, D)
    k_hat = k - k_mean
    g = jnp.swapaxes(k_hat, -2, -1) @ v                          # (B, H, D, D)
    k_sum = jnp.sum(k_hat, axis=2, keepdims=True)                # (B, H, 1, D)
    q_ksum_t = q @ jnp.swapaxes(k_sum, -2, -1)                   # (B, H, N, 1)
    t_d = jnp.ones_like(q_ksum_t) * N * scale + q_ksum_t
    t_n = jnp.ones((B, H, N, 1), x.dtype) * scale + q @ g        # (B, H, N, D)
    return (1.0 / t_d) * t_n


if __name__ == "__main__":
    # Small shapes consistent with the module: dim=C=32, num_heads=8 -> D=4.
    B, N, C, H = 2, 8, 32, 8

    key = jax.random.PRNGKey(0)
    kx, kw = jax.random.split(key)

    x = jax.random.normal(kx, (B, N, C), dtype=jnp.float32)
    # Deterministic Linear-style init (qkv_bias=False, so no bias).
    bound = 1.0 / math.sqrt(C)
    w_qkv = jax.random.uniform(kw, (3 * C, C), dtype=jnp.float32,
                               minval=-bound, maxval=bound)

    z_ref = taylor_attention_ref(x, w_qkv, num_heads=H)

    # f32 matmul operands: tight semantics check.
    z_f32 = jax.block_until_ready(
        taylor_attention(x, w_qkv, num_heads=H, compute_dtype=jnp.float32))
    assert z_f32.shape == (B, H, N, C // H), z_f32.shape
    assert jnp.allclose(z_f32, z_ref, atol=1e-2, rtol=1e-2), "f32 mismatch vs reference"

    # Default perf path: bf16 matmul operands, f32 accumulation -> looser tol.
    z_bf16 = jax.block_until_ready(taylor_attention(x, w_qkv, num_heads=H))
    assert z_bf16.shape == (B, H, N, C // H), z_bf16.shape
    assert jnp.allclose(z_bf16, z_ref, atol=8e-2, rtol=8e-2), "bf16 mismatch vs reference"

    print("KERNEL_OK")
</pallas_src>

<mosaic_0001>
module attributes {stable_mosaic.version = 11 : i64} {
  func.func @taylor_attn_kernel(%arg0: i32, %arg1: memref<2x8x32xf32, #tpu.memory_space<vmem>>, %arg2: memref<32x96xf32, #tpu.memory_space<vmem>>, %arg3: memref<32x32xf32, #tpu.memory_space<vmem>>, %arg4: memref<2x8x32xf32, #tpu.memory_space<vmem>>) attributes {dimension_semantics = [#tpu.dimension_semantics<parallel>], iteration_bounds = array<i64: 1>, scalar_prefetch = 0 : i64, scratch_operands = 0 : i64, tpu.core_type = #tpu.core_type<tc>, window_params = [{transform_indices = @transform_0, window_bounds = array<i64: 2, 8, 32>}, {pipeline_mode = #tpu.pipeline_mode<synchronous>, transform_indices = @transform_1, window_bounds = array<i64: 32, 96>}, {pipeline_mode = #tpu.pipeline_mode<synchronous>, transform_indices = @transform_2, window_bounds = array<i64: 32, 32>}, {transform_indices = @transform_3, window_bounds = array<i64: 2, 8, 32>}]} {
    %c0 = arith.constant 0 : index
    %c0_0 = arith.constant 0 : index
    %0 = vector.load %arg2[%c0, %c0_0] : memref<32x96xf32, #tpu.memory_space<vmem>>, vector<32x96xf32>
    %c0_1 = arith.constant 0 : index
    %c0_2 = arith.constant 0 : index
    %1 = vector.load %arg3[%c0_1, %c0_2] : memref<32x32xf32, #tpu.memory_space<vmem>>, vector<32x32xf32>
    %c0_3 = arith.constant 0 : index
    %c0_4 = arith.constant 0 : index
    %c0_5 = arith.constant 0 : index
    %2 = vector.load %arg1[%c0_3, %c0_4, %c0_5] : memref<2x8x32xf32, #tpu.memory_space<vmem>>, vector<2x8x32xf32>
    %3 = vector.shape_cast %2 : vector<2x8x32xf32> to vector<16x32xf32>
    %cst = arith.constant dense<0.000000e+00> : vector<16x96xf32>
    %4 = tpu.matmul %3, %0, %cst {dimension_numbers = #tpu.dot_dimension_numbers<[1], [0], [0], [1], [0, 0, 1, 1], [], []>} : vector<16x32xf32>, vector<32x96xf32>, vector<16x96xf32> -> vector<16x96xf32>
    %5 = vector.extract_strided_slice %4 {offsets = [0, 0], sizes = [8, 32], strides = [1, 1]} : vector<16x96xf32> to vector<8x32xf32>
    %6 = vector.extract_strided_slice %4 {offsets = [0, 32], sizes = [8, 32], strides = [1, 1]} : vector<16x96xf32> to vector<8x32xf32>
    %7 = vector.extract_strided_slice %4 {offsets = [0, 64], sizes = [8, 32], strides = [1, 1]} : vector<16x96xf32> to vector<8x32xf32>
    %cst_6 = arith.constant dense<0.000000e+00> : vector<32xf32>
    %8 = vector.multi_reduction <add>, %6, %cst_6 [0] : vector<8x32xf32> to vector<32xf32>
    %9 = vector.shape_cast %8 : vector<32xf32> to vector<1x32xf32>
    %cst_7 = arith.constant 8.000000e+00 : f32
    %10 = vector.broadcast %cst_7 : f32 to vector<1x32xf32>
    %11 = arith.divf %9, %10 : vector<1x32xf32>
    %12 = vector.broadcast %11 : vector<1x32xf32> to vector<8x32xf32>
    %13 = arith.subf %6, %12 : vector<8x32xf32>
    %cst_8 = arith.constant dense<0.000000e+00> : vector<32x32xf32>
    %14 = tpu.matmul %13, %7, %cst_8 {dimension_numbers = #tpu.dot_dimension_numbers<[0], [0], [1], [1], [0, 1, 1, 1], [], []>} : vector<8x32xf32>, vector<8x32xf32>, vector<32x32xf32> -> vector<32x32xf32>
    %15 = arith.mulf %14, %1 : vector<32x32xf32>
    %cst_9 = arith.constant dense<0.000000e+00> : vector<8x32xf32>
    %16 = tpu.matmul %5, %15, %cst_9 {dimension_numbers = #tpu.dot_dimension_numbers<[1], [0], [0], [1], [0, 0, 1, 1], [], []>} : vector<8x32xf32>, vector<32x32xf32>, vector<8x32xf32> -> vector<8x32xf32>
    %cst_10 = arith.constant 2.500000e-01 : f32
    %17 = vector.broadcast %cst_10 : f32 to vector<8x32xf32>
    %18 = arith.mulf %16, %17 : vector<8x32xf32>
    %cst_11 = arith.constant 1.250000e-01 : f32
    %19 = vector.broadcast %cst_11 : f32 to vector<8x32xf32>
    %20 = arith.addf %18, %19 : vector<8x32xf32>
    %c0_12 = arith.constant 0 : index
    %c0_13 = arith.constant 0 : index
    %c0_14 = arith.constant 0 : index
    %21 = vector.load %arg4[%c0_12, %c0_13, %c0_14] : memref<2x8x32xf32, #tpu.memory_space<vmem>>, vector<1x8x32xf32>
    %22 = vector.shape_cast %21 : vector<1x8x32xf32> to vector<8x32xf32>
    %23 = vector.shape_cast %20 : vector<8x32xf32> to vector<1x8x32xf32>
    tpu.vector_store %arg4[%c0_12, %c0_13, %c0_14], %23 {strides = array<i32>} : memref<2x8x32xf32, #tpu.memory_space<vmem>>, vector<1x8x32xf32>,
    %24 = vector.extract_strided_slice %4 {offsets = [8, 0], sizes = [8, 32], strides = [1, 1]} : vector<16x96xf32> to vector<8x32xf32>
    %25 = vector.extract_strided_slice %4 {offsets = [8, 32], sizes = [8, 32], strides = [1, 1]} : vector<16x96xf32> to vector<8x32xf32>
    %26 = vector.extract_strided_slice %4 {offsets = [8, 64], sizes = [8, 32], strides = [1, 1]} : vector<16x96xf32> to vector<8x32xf32>
    %cst_15 = arith.constant dense<0.000000e+00> : vector<32xf32>
    %27 = vector.multi_reduction <add>, %25, %cst_15 [0] : vector<8x32xf32> to vector<32xf32>
    %28 = vector.shape_cast %27 : vector<32xf32> to vector<1x32xf32>
    %cst_16 = arith.constant 8.000000e+00 : f32
    %29 = vector.broadcast %cst_16 : f32 to vector<1x32xf32>
    %30 = arith.divf %28, %29 : vector<1x32xf32>
    %31 = vector.broadcast %30 : vector<1x32xf32> to vector<8x32xf32>
    %32 = arith.subf %25, %31 : vector<8x32xf32>
    %cst_17 = arith.constant dense<0.000000e+00> : vector<32x32xf32>
    %33 = tpu.matmul %32, %26, %cst_17 {dimension_numbers = #tpu.dot_dimension_numbers<[0], [0], [1], [1], [0, 1, 1, 1], [], []>} : vector<8x32xf32>, vector<8x32xf32>, vector<32x32xf32> -> vector<32x32xf32>
    %34 = arith.mulf %33, %1 : vector<32x32xf32>
    %cst_18 = arith.constant dense<0.000000e+00> : vector<8x32xf32>
    %35 = tpu.matmul %24, %34, %cst_18 {dimension_numbers = #tpu.dot_dimension_numbers<[1], [0], [0], [1], [0, 0, 1, 1], [], []>} : vector<8x32xf32>, vector<32x32xf32>, vector<8x32xf32> -> vector<8x32xf32>
    %cst_19 = arith.constant 2.500000e-01 : f32
    %36 = vector.broadcast %cst_19 : f32 to vector<8x32xf32>
    %37 = arith.mulf %35, %36 : vector<8x32xf32>
    %cst_20 = arith.constant 1.250000e-01 : f32
    %38 = vector.broadcast %cst_20 : f32 to vector<8x32xf32>
    %39 = arith.addf %37, %38 : vector<8x32xf32>
    %c1 = arith.constant 1 : index
    %c0_21 = arith.constant 0 : index
    %c0_22 = arith.constant 0 : index
    %40 = vector.load %arg4[%c1, %c0_21, %c0_22] : memref<2x8x32xf32, #tpu.memory_space<vmem>>, vector<1x8x32xf32>
    %41 = vector.shape_cast %40 : vector<1x8x32xf32> to vector<8x32xf32>
    %42 = vector.shape_cast %39 : vector<8x32xf32> to vector<1x8x32xf32>
    tpu.vector_store %arg4[%c1, %c0_21, %c0_22], %42 {strides = array<i32>} : memref<2x8x32xf32, #tpu.memory_space<vmem>>, vector<1x8x32xf32>,
    return
  }
  func.func @transform_0(%arg0: i32) -> (i32, i32, i32) {
    %c0_i32 = arith.constant 0 : i32
    %c0_i32_0 = arith.constant 0 : i32
    %c0_i32_1 = arith.constant 0 : i32
    return %arg0, %c0_i32, %c0_i32_0 : i32, i32, i32
  }
  func.func @transform_1(%arg0: i32) -> (i32, i32) {
    %c0_i32 = arith.constant 0 : i32
    %c0_i32_0 = arith.constant 0 : i32
    %c0_i32_1 = arith.constant 0 : i32
    return %c0_i32, %c0_i32_0 : i32, i32
  }
  func.func @transform_2(%arg0: i32) -> (i32, i32) {
    %c0_i32 = arith.constant 0 : i32
    %c0_i32_0 = arith.constant 0 : i32
    %c0_i32_1 = arith.constant 0 : i32
    return %c0_i32, %c0_i32_0 : i32, i32
  }
  func.func @transform_3(%arg0: i32) -> (i32, i32, i32) {
    %c0_i32 = arith.constant 0 : i32
    %c0_i32_0 = arith.constant 0 : i32
    %c0_i32_1 = arith.constant 0 : i32
    return %arg0, %c0_i32, %c0_i32_0 : i32, i32, i32
  }
}

</mosaic_0001>

<bundles_post_ra>
// kernel: taylor_attention.1
= control target key start
LH: loop header
LB: loop body
LE: loop exit
PB: predicated region body
PF: predicated region fallthrough
CT: control target
= control target key end

     0   :  { %8 = vsyncpa [#allocation3], 0  ;;  %s376_s15 = smov [#allocation2]   ;;  %s377_s17 = smov 128   ;;  %s461_s0 = inlined_call_operand.hbm [shape: f32[2,8,32], index: 0, kind: input, shape index: {}]   ;;  %s462_s1 = inlined_call_operand.vmem [shape: f32[32,96], index: 1, kind: input, shape index: {}]   ;;  %s463_s2 = inlined_call_operand.vmem [shape: f32[32,32], index: 2, kind: input, shape index: {}]   ;;  %s464_s3 = inlined_call_operand.vmem [shape: f32[2,8,32], index: 3, kind: output, shape index: {}]  }
   0x1   :  { %s13_s14 = sshll.u32 %s461_s0, 4  ;;  %s15_s16 = sshll.u32 %s376_s15, 4  ;;  %s14_s14 = int_to_ptr.hbm [resolvable:$true] %s13_s14  ;;  %s16_s16 = int_to_ptr.vmem [resolvable:$true] %s15_s16 }
   0x2   :  { %s378_s18 = smov 8  }
   0x3   :  { %21 = dma.hbm_to_vmem [thread:$0]  %s14_s14, 256, %s16_s16, [#allocation3], %s377_s17, %s377_s17, %s378_s18  }
   0x4   :  { %374 = dma.done.wait [#allocation3], 256  }
   0x5   :  { %375 = vsyncadd [#allocation3], 4294967040  ;;  %v33_v0 = vld [vmem:[%s462_s1 + $0x18] sm:$0xff]  ;;  %v32_v1 = vld [vmem:[%s462_s1 + $0x10] sm:$0xff]  ;;  %vm40_vm0 = vcmask 261120   ;;  %v379_v6 = vmov 8.0  }
   0x6   :  { %59 = vmatpush.msra.mxu0 %v33_v0  ;;  %v31_v2 = vld [vmem:[%s462_s1 + $0x8] sm:$0xff]  ;;  %v30_v3 = vld [vmem:[%s462_s1] sm:$0xff]  ;;  %348 = vrcp.f32 %v379_v6  ;;  %vm70_vm1 = vcmask 523520   ;;  %s380_s1 = smov 64   ;;  %s381_s26 = smov 96   ;;  %vm127_vm3 = vcmask 64512  }
   0x7   :  { %v38_v4 = vld [vmem:[#allocation2] sm:$0xff]  ;;  %v39_v5 = vld [vmem:[#allocation2 + $0x8] sm:$0xff]  ;;  %v37_v53 = vld [vmem:[%s463_s2 + $0x18] sm:$0xff] }
   0x8   :  { %60 = vmatpush.msra.mxu0 %v32_v1  ;;  %v36_v54 = vld [vmem:[%s463_s2 + $0x10] sm:$0xff]  ;;  %v35_v57 = vld [vmem:[%s463_s2 + $0x8] sm:$0xff]  ;;  %v34_v59 = vld [vmem:[%s463_s2] sm:$0xff] }
   0xa   :  { %61 = vmatpush.msra.mxu0 %v31_v2 }
   0xc   :  { %62 = vmatpush.msra.mxu0 %v30_v3  ;;  %v349_v7 = vpop.eup %348 }
   0xd   :  { %323 = vmatmul.msk.f32.vlgmr.msra.gmra.mxu0 %vm40_vm0, %v38_v4  ;;  %v79_v8 = vmul.f32 8.0, %v349_v7  ;;  %vm83_vm2 = vweird.f32 %v349_v7 }
   0xf   :  { %v80_v9 = vsub.f32 1.0, %v79_v8 }
  0x11   :  { %v81_v13 = vmul.f32 %v349_v7, %v80_v9 }
  0x13   :  { %v82_v16 = vadd.f32 %v349_v7, %v81_v13 }
  0x15   :  { %324 = vmatmul.msk.f32.gmra.mxu0 %vm40_vm0, %v39_v5  ;;  %v84_v23 = vsel %vm83_vm2, %v349_v7, %v82_v16 }
  0x8a   :  { %v419_v10 = vpop.f32.mrf.mxu0 }
  0x8b   :  { %v71_v11 = vsel %vm70_vm1, %v419_v10, 0.0 }
  0x8c   :  { %v72_v12 = vrot.slane %v71_v11, 4 }
  0x8e   :  { %v73_v14 = vadd.f32 %v72_v12, %v71_v11 }
  0x90   :  { %v74_v15 = vrot.slane %v73_v14, 2 }
  0x92   :  { %v422_v17 = vpop.f32.mrf.mxu0  ;;  %v75_v18 = vadd.f32 %v74_v15, %v73_v14 }
  0x93   :  { %v198_v19 = vsel %vm70_vm1, %v422_v17, 0.0  ;;  %v343_v20 = vpack.i.bf16 %v422_v17, %v419_v10 }
  0x94   :  { %v199_v21 = vrot.slane %v198_v19, 4  ;;  %v76_v22 = vrot.slane %v75_v18, 1 }
  0x95   :  { %344 = vrot.lane.b32.xlu1 %v343_v20, %s380_s1 }
  0x96   :  { %v200_v24 = vadd.f32 %v199_v21, %v198_v19  ;;  %v77_v25 = vadd.f32 %v76_v22, %v75_v18 }
  0x98   :  { %v201_v26 = vrot.slane %v200_v24, 2  ;;  %v85_v27 = vmul.f32 %v84_v23, %v77_v25 }
  0x9a   :  { %v202_v28 = vadd.f32 %v201_v26, %v200_v24  ;;  %v86_v29 = vsub.f32 %v419_v10, %v85_v27 }
  0x9c   :  { %v203_v30 = vrot.slane %v202_v28, 1  ;;  %88 = vrot.lane.b32.xlu0 %v86_v29, %s381_s26 }
  0x9e   :  { %v204_v31 = vadd.f32 %v203_v30, %v202_v28 }
  0xa0   :  { %v205_v32 = vmul.f32 %v204_v31, %v84_v23 }
  0xa2   :  { %v206_v33 = vsub.f32 %v422_v17, %v205_v32 }
  0xa4   :  { %208 = vrot.lane.b32.xlu0 %v206_v33, %s381_s26 }
 0x107   :  { %v345_v34 = vpop.permute.xlu1 %344 }
 0x108   :  { %v346_v35 = vunpack.i.l.bf16 %v345_v34  ;;  %v347_v36 = vunpack.i.h.bf16 %v345_v34 }
 0x10a   :  { %155 = vmatpush.msra.mxu1 %v346_v35  ;;  %274 = vmatpush.msra.mxu3 %v347_v36 }
 0x10e   :  { %v89_v37 = vpop.permute.xlu0 %88 }
 0x10f   :  { %91 = vxpose.xlu1.b32.start.end [1/1] (short) (narrow) %v89_v37, 32 }
 0x116   :  { %v209_v38 = vpop.permute.xlu0 %208 }
 0x117   :  { %211 = vxpose.xlu2.b32.start.end [1/1] (short) (narrow) %v209_v38, 32 }
 0x1b0   :  { %v227_v39 = vpop.trf.xlu2 }
 0x1b1   :  { %330 = vmatmul.msk.f32.vlgmr.msra.gmra.mxu3 %vm127_vm3, %v227_v39 }
 0x1b3   :  { %v107_v40 = vpop.trf.xlu1 }
 0x1b4   :  { %325 = vmatmul.msk.f32.vlgmr.msra.gmra.mxu1 %vm127_vm3, %v107_v40 }
 0x1b8   :  { %v228_v41 = vpop.trf.xlu2 }
 0x1b9   :  { %331 = vmatmul.msk.f32.gmra.mxu3 %vm127_vm3, %v228_v41 }
 0x1bb   :  { %v108_v42 = vpop.trf.xlu1 }
 0x1bc   :  { %326 = vmatmul.msk.f32.gmra.mxu1 %vm127_vm3, %v108_v42 }
 0x1c0   :  { %v229_v43 = vpop.trf.xlu2 }
 0x1c1   :  { %332 = vmatmul.msk.f32.gmra.mxu3 %vm127_vm3, %v229_v43 }
 0x1c3   :  { %v109_v44 = vpop.trf.xlu1 }
 0x1c4   :  { %327 = vmatmul.msk.f32.gmra.mxu1 %vm127_vm3, %v109_v44 }
 0x1c8   :  { %v230_v45 = vpop.trf.xlu2 }
 0x1c9   :  { %333 = vmatmul.msk.f32.gmra.mxu3 %vm127_vm3, %v230_v45 }
 0x1cb   :  { %v110_v46 = vpop.trf.xlu1 }
 0x1cc   :  { %328 = vmatmul.msk.f32.gmra.mxu1 %vm127_vm3, %v110_v46 }
 0x231   :  { %v157_v47 = vpop.f32.mrf.mxu1 }
 0x232   :  { %v169_v62 = vmul.f32 %v157_v47, %v34_v59 }
 0x234   :  { %v276_v48 = vpop.f32.mrf.mxu3 }
 0x235   :  { %v288_v2 = vmul.f32 %v276_v48, %v34_v59 }
 0x239   :  { %v160_v49 = vpop.f32.mrf.mxu1 }
 0x23a   :  { %v170_v61 = vmul.f32 %v160_v49, %v35_v57 }
 0x23c   :  { %v279_v50 = vpop.f32.mrf.mxu3 }
 0x23d   :  { %v289_v1 = vmul.f32 %v279_v50, %v35_v57 }
 0x241   :  { %v163_v51 = vpop.f32.mrf.mxu1 }
 0x242   :  { %v171_v58 = vmul.f32 %v163_v51, %v36_v54 }
 0x244   :  { %v282_v52 = vpop.f32.mrf.mxu3 }
 0x245   :  { %v290_v0 = vmul.f32 %v282_v52, %v36_v54 }
 0x249   :  { %v166_v55 = vpop.f32.mrf.mxu1 }
 0x24a   :  { %v172_v56 = vmul.f32 %v166_v55, %v37_v53 }
 0x24c   :  { %187 = vmatpush.msra.mxu2 %v172_v56  ;;  %v285_v60 = vpop.f32.mrf.mxu3 }
 0x24d   :  { %v291_v63 = vmul.f32 %v285_v60, %v37_v53 }
 0x24e   :  { %188 = vmatpush.msra.mxu2 %v171_v58 }
 0x250   :  { %189 = vmatpush.msra.mxu2 %v170_v61 }
 0x252   :  { %190 = vmatpush.msra.mxu2 %v169_v62 }
 0x253   :  { %329 = vmatmul.msk.f32.vlgmr.msra.gmra.mxu2 %vm40_vm0, %v419_v10 }
 0x254   :  { %306 = vmatpush.msrb.mxu2 %v291_v63 }
 0x256   :  { %307 = vmatpush.msrb.mxu2 %v290_v0 }
 0x258   :  { %308 = vmatpush.msrb.mxu2 %v289_v1 }
 0x25a   :  { %309 = vmatpush.msrb.mxu2 %v288_v2 }
 0x25b   :  { %334 = vmatmul.msk.f32.vlgmr.msrb.gmra.mxu2 %vm40_vm0, %v422_v17 }
 0x2d6   :  { %v192_v3 = vpop.f32.mrf.mxu2 }
 0x2d7   :  { %v195_v4 = vmul.f32 0.25, %v192_v3 }
 0x2d9   :  { %v196_v5 = vadd.f32 0.125, %v195_v4 }
 0x2db   :  { %197 = vst.msk [vmem:[%s464_s3] sm:$0xff] %vm40_vm0, %v196_v5 }
 0x2de   :  { %v311_v6 = vpop.f32.mrf.mxu2 }
 0x2df   :  { %v314_v7 = vmul.f32 0.25, %v311_v6 }
 0x2e1   :  { %v315_v8 = vadd.f32 0.125, %v314_v7 }
 0x2e3   :  { %335 = vst.msk [vmem:[%s464_s3 + $0x8] sm:$0xff] %vm40_vm0, %v315_v8 }
 0x2e4   :  { %322 = vsyncpa [#allocation3], 1 }

</bundles_post_ra>
